<compile_context>
chip_gen: v5e
topology: v5e:2x2
jax: 0.10.0
libtpu: 0.0.40
codegen_flags: <defaults>
</compile_context>

<pallas_src>
import jax
import jax.numpy as jnp
from jax.experimental import pallas as pl
from jax.experimental.pallas import tpu as pltpu


def _round_up(n, m):
    return ((n + m - 1) // m) * m


def ulight_ot_kernel(eps_ref, x_ref, s_kd_ref, r_kd_ref, s_dk_ref, r_dk_ref,
                     la_ref, g_ref, z_ref, o_ref):
    # Shapes (static): x (D, TB), S/r (K, D) and (D, K), la (K, 1),
    #                  g (K, TB), z (D, TB), out (D, TB).
    eps = eps_ref[0]
    inv_2eps = 0.5 / eps

    x = x_ref[...]                                   # (D, TB)
    xx = x * x
    S_kd = s_kd_ref[...]                             # (K, D)
    r_kd = r_kd_ref[...]                             # (K, D)
    S_dk = s_dk_ref[...]                             # (D, K)
    r_dk = r_dk_ref[...]                             # (D, K)
    la = la_ref[...]                                 # (K, 1)
    g = g_ref[...]                                   # (K, TB)
    z = z_ref[...]                                   # (D, TB)

    K, D = s_kd_ref.shape
    TB = x_ref.shape[1]

    # ---- mixture logits (K, TB): contraction over tiny D unrolled on the VPU
    # (no MXU: at D=2 / K=5 a matmul would be ~1% utilized and pay full drain).
    acc = jnp.zeros((K, TB), jnp.float32)
    for d in range(D):
        xd = x[d:d + 1, :]                           # (1, TB)  sublane-broadcast
        xxd = xx[d:d + 1, :]
        acc = acc + S_kd[:, d:d + 1] * xxd + (2.0 * r_kd[:, d:d + 1]) * xd
    logits = acc * inv_2eps + la                     # (K, TB)

    # ---- categorical via Gumbel-max; exact one-hot with first-max tie-break
    pert = logits + g                                # (K, TB)
    m = jnp.max(pert, axis=0, keepdims=True)         # (1, TB)
    kiota = jax.lax.broadcasted_iota(jnp.int32, (K, TB), 0).astype(jnp.float32)
    cand = jnp.where(pert >= m, kiota, jnp.float32(K))
    sel = jnp.min(cand, axis=0, keepdims=True)       # (1, TB) index of first max
    onehot = (kiota == sel).astype(jnp.float32)      # (K, TB), exactly one 1/col

    # ---- gather selected component params: unrolled broadcast-FMA over K
    r_sel = jnp.zeros((D, TB), jnp.float32)
    S_sel = jnp.zeros((D, TB), jnp.float32)
    for k in range(K):
        oh_k = onehot[k:k + 1, :]                    # (1, TB)
        r_sel = r_sel + oh_k * r_dk[:, k:k + 1]      # (D,1)*(1,TB) -> (D,TB)
        S_sel = S_sel + oh_k * S_dk[:, k:k + 1]

    # ---- Gaussian sample: loc = r[k*] + S[k*]*x, scale = sqrt(eps*S[k*])
    mean = r_sel + S_sel * x
    o_ref[...] = (mean + jnp.sqrt(eps * S_sel) * z).astype(o_ref.dtype)


def ulight_ot_forward(x, S_diag, r, log_alpha, *, epsilon, key, tile_b=2048):
    """x: (B, D); S_diag, r: (K, D); log_alpha: (K,). Returns samples (B, D)."""
    B, D = x.shape
    K = r.shape[0]

    # Batch lives on the lane axis: pad B up to a multiple of 128 / TILE_B.
    tile_b = min(tile_b, _round_up(B, 128))
    B_pad = _round_up(B, tile_b)
    grid = (B_pad // tile_b,)

    x_t = jnp.pad(x.astype(jnp.float32).T, ((0, 0), (0, B_pad - B)))   # (D, B_pad)

    # Noise drawn outside the kernel (independent per padded column).
    k_g, k_z = jax.random.split(key)
    g = jax.random.gumbel(k_g, (K, B_pad), dtype=jnp.float32)
    z = jax.random.normal(k_z, (D, B_pad), dtype=jnp.float32)

    eps_arr = jnp.asarray([epsilon], dtype=jnp.float32)
    S_kd = S_diag.astype(jnp.float32)                 # (K, D)
    r_kd = r.astype(jnp.float32)                      # (K, D)
    S_dk = S_kd.T                                     # (D, K)
    r_dk = r_kd.T                                     # (D, K)
    la = log_alpha.reshape(K, 1).astype(jnp.float32)  # (K, 1)

    out_t = pl.pallas_call(
        ulight_ot_kernel,
        out_shape=jax.ShapeDtypeStruct((D, B_pad), jnp.float32),
        grid=grid,
        in_specs=[
            pl.BlockSpec(memory_space=pltpu.MemorySpace.SMEM),       # epsilon
            pl.BlockSpec((D, tile_b), lambda i: (0, i)),             # x_t
            pl.BlockSpec((K, D), lambda i: (0, 0)),                  # S (K,D) resident
            pl.BlockSpec((K, D), lambda i: (0, 0)),                  # r (K,D) resident
            pl.BlockSpec((D, K), lambda i: (0, 0)),                  # S (D,K) resident
            pl.BlockSpec((D, K), lambda i: (0, 0)),                  # r (D,K) resident
            pl.BlockSpec((K, 1), lambda i: (0, 0)),                  # log_alpha resident
            pl.BlockSpec((K, tile_b), lambda i: (0, i)),             # gumbel noise
            pl.BlockSpec((D, tile_b), lambda i: (0, i)),             # gaussian noise
        ],
        out_specs=pl.BlockSpec((D, tile_b), lambda i: (0, i)),
        compiler_params=pltpu.CompilerParams(
            dimension_semantics=("parallel",)),
    )(eps_arr, x_t, S_kd, r_kd, S_dk, r_dk, la, g, z)

    return out_t[:, :B].T                             # back to (B, D)


if __name__ == "__main__":
    # Module defaults: dim=2, k_potentials=5, epsilon=1, is_diagonal=True,
    # S_diagonal_init=0.1, sampling_batch_size=1.  Small batch of 8 inputs.
    dim = 2
    k_potentials = 5
    batch = 8
    epsilon = 1.0
    S_diagonal_init = 0.1

    key = jax.random.PRNGKey(0)
    kx, kr, knoise = jax.random.split(key, 3)

    # Deterministic parameter init mirroring __init__ (diagonal path; Sigma/mu/
    # log_beta and the geotorch-orthogonal rotation matrices are unused by forward()).
    x = jax.random.normal(kx, (batch, dim), dtype=jnp.float32)
    r = jax.random.normal(kr, (k_potentials, dim), dtype=jnp.float32)
    S_log_diag = jnp.log(S_diagonal_init * jnp.ones((k_potentials, dim), jnp.float32))
    log_alpha_raw = epsilon * jnp.log(jnp.ones((k_potentials,), jnp.float32) / k_potentials)

    S_diag = jnp.exp(S_log_diag)                    # get_S()  (diagonal)
    log_alpha = (1.0 / epsilon) * log_alpha_raw     # get_log_alpha()

    out = ulight_ot_forward(x, S_diag, r, log_alpha, epsilon=epsilon, key=knoise)
    out = jax.block_until_ready(out)

    assert out.shape == (batch, dim), out.shape
    assert out.dtype == jnp.float32
    assert bool(jnp.all(jnp.isfinite(out)))
    print("KERNEL_OK")
</pallas_src>

<mosaic_0001>
module attributes {stable_mosaic.version = 11 : i64} {
  func.func @ulight_ot_kernel(%arg0: i32, %arg1: memref<1xf32, #tpu.memory_space<smem>>, %arg2: memref<2x128xf32, #tpu.memory_space<vmem>>, %arg3: memref<5x2xf32, #tpu.memory_space<vmem>>, %arg4: memref<5x2xf32, #tpu.memory_space<vmem>>, %arg5: memref<2x5xf32, #tpu.memory_space<vmem>>, %arg6: memref<2x5xf32, #tpu.memory_space<vmem>>, %arg7: memref<5x1xf32, #tpu.memory_space<vmem>>, %arg8: memref<5x128xf32, #tpu.memory_space<vmem>>, %arg9: memref<2x128xf32, #tpu.memory_space<vmem>>, %arg10: memref<2x128xf32, #tpu.memory_space<vmem>>) attributes {dimension_semantics = [#tpu.dimension_semantics<parallel>], iteration_bounds = array<i64: 1>, scalar_prefetch = 0 : i64, scratch_operands = 0 : i64, tpu.core_type = #tpu.core_type<tc>, window_params = [{transform_indices = @transform_0, window_bounds = array<i64: 1>}, {transform_indices = @transform_1, window_bounds = array<i64: 2, 128>}, {pipeline_mode = #tpu.pipeline_mode<synchronous>, transform_indices = @transform_2, window_bounds = array<i64: 5, 2>}, {pipeline_mode = #tpu.pipeline_mode<synchronous>, transform_indices = @transform_3, window_bounds = array<i64: 5, 2>}, {pipeline_mode = #tpu.pipeline_mode<synchronous>, transform_indices = @transform_4, window_bounds = array<i64: 2, 5>}, {pipeline_mode = #tpu.pipeline_mode<synchronous>, transform_indices = @transform_5, window_bounds = array<i64: 2, 5>}, {pipeline_mode = #tpu.pipeline_mode<synchronous>, transform_indices = @transform_6, window_bounds = array<i64: 5, 1>}, {transform_indices = @transform_7, window_bounds = array<i64: 5, 128>}, {transform_indices = @transform_8, window_bounds = array<i64: 2, 128>}, {transform_indices = @transform_9, window_bounds = array<i64: 2, 128>}]} {
    %c0 = arith.constant 0 : index
    %0 = memref.load %arg1[%c0] : memref<1xf32, #tpu.memory_space<smem>>
    %cst = arith.constant 5.000000e-01 : f32
    %1 = arith.divf %cst, %0 : f32
    %c0_0 = arith.constant 0 : index
    %c0_1 = arith.constant 0 : index
    %2 = vector.load %arg2[%c0_0, %c0_1] : memref<2x128xf32, #tpu.memory_space<vmem>>, vector<2x128xf32>
    %3 = arith.mulf %2, %2 : vector<2x128xf32>
    %c0_2 = arith.constant 0 : index
    %c0_3 = arith.constant 0 : index
    %4 = vector.load %arg3[%c0_2, %c0_3] : memref<5x2xf32, #tpu.memory_space<vmem>>, vector<5x2xf32>
    %c0_4 = arith.constant 0 : index
    %c0_5 = arith.constant 0 : index
    %5 = vector.load %arg4[%c0_4, %c0_5] : memref<5x2xf32, #tpu.memory_space<vmem>>, vector<5x2xf32>
    %c0_6 = arith.constant 0 : index
    %c0_7 = arith.constant 0 : index
    %6 = vector.load %arg5[%c0_6, %c0_7] : memref<2x5xf32, #tpu.memory_space<vmem>>, vector<2x5xf32>
    %c0_8 = arith.constant 0 : index
    %c0_9 = arith.constant 0 : index
    %7 = vector.load %arg6[%c0_8, %c0_9] : memref<2x5xf32, #tpu.memory_space<vmem>>, vector<2x5xf32>
    %c0_10 = arith.constant 0 : index
    %c0_11 = arith.constant 0 : index
    %8 = vector.load %arg7[%c0_10, %c0_11] : memref<5x1xf32, #tpu.memory_space<vmem>>, vector<5x1xf32>
    %c0_12 = arith.constant 0 : index
    %c0_13 = arith.constant 0 : index
    %9 = vector.load %arg8[%c0_12, %c0_13] : memref<5x128xf32, #tpu.memory_space<vmem>>, vector<5x128xf32>
    %c0_14 = arith.constant 0 : index
    %c0_15 = arith.constant 0 : index
    %10 = vector.load %arg9[%c0_14, %c0_15] : memref<2x128xf32, #tpu.memory_space<vmem>>, vector<2x128xf32>
    %cst_16 = arith.constant 0.000000e+00 : f32
    %11 = vector.broadcast %cst_16 : f32 to vector<5x128xf32>
    %12 = vector.extract_strided_slice %2 {offsets = [0, 0], sizes = [1, 128], strides = [1, 1]} : vector<2x128xf32> to vector<1x128xf32>
    %13 = vector.extract_strided_slice %3 {offsets = [0, 0], sizes = [1, 128], strides = [1, 1]} : vector<2x128xf32> to vector<1x128xf32>
    %14 = vector.extract_strided_slice %4 {offsets = [0, 0], sizes = [5, 1], strides = [1, 1]} : vector<5x2xf32> to vector<5x1xf32>
    %15 = vector.broadcast %14 : vector<5x1xf32> to vector<5x128xf32>
    %16 = vector.broadcast %13 : vector<1x128xf32> to vector<5x128xf32>
    %17 = arith.mulf %15, %16 : vector<5x128xf32>
    %18 = arith.addf %11, %17 : vector<5x128xf32>
    %19 = vector.extract_strided_slice %5 {offsets = [0, 0], sizes = [5, 1], strides = [1, 1]} : vector<5x2xf32> to vector<5x1xf32>
    %cst_17 = arith.constant 2.000000e+00 : f32
    %20 = vector.broadcast %cst_17 : f32 to vector<5x1xf32>
    %21 = arith.mulf %20, %19 : vector<5x1xf32>
    %22 = vector.broadcast %21 : vector<5x1xf32> to vector<5x128xf32>
    %23 = vector.broadcast %12 : vector<1x128xf32> to vector<5x128xf32>
    %24 = arith.mulf %22, %23 : vector<5x128xf32>
    %25 = arith.addf %18, %24 : vector<5x128xf32>
    %26 = vector.extract_strided_slice %2 {offsets = [1, 0], sizes = [1, 128], strides = [1, 1]} : vector<2x128xf32> to vector<1x128xf32>
    %27 = vector.extract_strided_slice %3 {offsets = [1, 0], sizes = [1, 128], strides = [1, 1]} : vector<2x128xf32> to vector<1x128xf32>
    %28 = vector.extract_strided_slice %4 {offsets = [0, 1], sizes = [5, 1], strides = [1, 1]} : vector<5x2xf32> to vector<5x1xf32>
    %29 = vector.broadcast %28 : vector<5x1xf32> to vector<5x128xf32>
    %30 = vector.broadcast %27 : vector<1x128xf32> to vector<5x128xf32>
    %31 = arith.mulf %29, %30 : vector<5x128xf32>
    %32 = arith.addf %25, %31 : vector<5x128xf32>
    %33 = vector.extract_strided_slice %5 {offsets = [0, 1], sizes = [5, 1], strides = [1, 1]} : vector<5x2xf32> to vector<5x1xf32>
    %cst_18 = arith.constant 2.000000e+00 : f32
    %34 = vector.broadcast %cst_18 : f32 to vector<5x1xf32>
    %35 = arith.mulf %34, %33 : vector<5x1xf32>
    %36 = vector.broadcast %35 : vector<5x1xf32> to vector<5x128xf32>
    %37 = vector.broadcast %26 : vector<1x128xf32> to vector<5x128xf32>
    %38 = arith.mulf %36, %37 : vector<5x128xf32>
    %39 = arith.addf %32, %38 : vector<5x128xf32>
    %40 = vector.broadcast %1 : f32 to vector<5x128xf32>
    %41 = arith.mulf %39, %40 : vector<5x128xf32>
    %42 = vector.broadcast %8 : vector<5x1xf32> to vector<5x128xf32>
    %43 = arith.addf %41, %42 : vector<5x128xf32>
    %44 = arith.addf %43, %9 : vector<5x128xf32>
    %cst_19 = arith.constant dense<0xFF800000> : vector<128xf32>
    %45 = vector.multi_reduction <maximumf>, %44, %cst_19 [0] : vector<5x128xf32> to vector<128xf32>
    %46 = vector.shape_cast %45 : vector<128xf32> to vector<1x128xf32>
    %47 = tpu.iota {dimensions = array<i32: 0>} : vector<5x128xi32>
    %48 = arith.sitofp %47 : vector<5x128xi32> to vector<5x128xf32>
    %49 = vector.broadcast %46 : vector<1x128xf32> to vector<5x128xf32>
    %50 = arith.cmpf oge, %44, %49 : vector<5x128xf32>
    %cst_20 = arith.constant 5.000000e+00 : f32
    %51 = vector.broadcast %cst_20 : f32 to vector<5x128xf32>
    %52 = arith.select %50, %48, %51 : vector<5x128xi1>, vector<5x128xf32>
    %cst_21 = arith.constant dense<0x7F800000> : vector<128xf32>
    %53 = vector.multi_reduction <minimumf>, %52, %cst_21 [0] : vector<5x128xf32> to vector<128xf32>
    %54 = vector.shape_cast %53 : vector<128xf32> to vector<1x128xf32>
    %55 = vector.broadcast %54 : vector<1x128xf32> to vector<5x128xf32>
    %56 = arith.cmpf oeq, %48, %55 : vector<5x128xf32>
    %57 = arith.extui %56 : vector<5x128xi1> to vector<5x128xi32>
    %58 = arith.sitofp %57 : vector<5x128xi32> to vector<5x128xf32>
    %cst_22 = arith.constant 0.000000e+00 : f32
    %59 = vector.broadcast %cst_22 : f32 to vector<2x128xf32>
    %cst_23 = arith.constant 0.000000e+00 : f32
    %60 = vector.broadcast %cst_23 : f32 to vector<2x128xf32>
    %61 = vector.extract_strided_slice %58 {offsets = [0, 0], sizes = [1, 128], strides = [1, 1]} : vector<5x128xf32> to vector<1x128xf32>
    %62 = vector.extract_strided_slice %7 {offsets = [0, 0], sizes = [2, 1], strides = [1, 1]} : vector<2x5xf32> to vector<2x1xf32>
    %63 = vector.broadcast %61 : vector<1x128xf32> to vector<2x128xf32>
    %64 = vector.broadcast %62 : vector<2x1xf32> to vector<2x128xf32>
    %65 = arith.mulf %63, %64 : vector<2x128xf32>
    %66 = arith.addf %59, %65 : vector<2x128xf32>
    %67 = vector.extract_strided_slice %6 {offsets = [0, 0], sizes = [2, 1], strides = [1, 1]} : vector<2x5xf32> to vector<2x1xf32>
    %68 = vector.broadcast %61 : vector<1x128xf32> to vector<2x128xf32>
    %69 = vector.broadcast %67 : vector<2x1xf32> to vector<2x128xf32>
    %70 = arith.mulf %68, %69 : vector<2x128xf32>
    %71 = arith.addf %60, %70 : vector<2x128xf32>
    %72 = vector.extract_strided_slice %58 {offsets = [1, 0], sizes = [1, 128], strides = [1, 1]} : vector<5x128xf32> to vector<1x128xf32>
    %73 = vector.extract_strided_slice %7 {offsets = [0, 1], sizes = [2, 1], strides = [1, 1]} : vector<2x5xf32> to vector<2x1xf32>
    %74 = vector.broadcast %72 : vector<1x128xf32> to vector<2x128xf32>
    %75 = vector.broadcast %73 : vector<2x1xf32> to vector<2x128xf32>
    %76 = arith.mulf %74, %75 : vector<2x128xf32>
    %77 = arith.addf %66, %76 : vector<2x128xf32>
    %78 = vector.extract_strided_slice %6 {offsets = [0, 1], sizes = [2, 1], strides = [1, 1]} : vector<2x5xf32> to vector<2x1xf32>
    %79 = vector.broadcast %72 : vector<1x128xf32> to vector<2x128xf32>
    %80 = vector.broadcast %78 : vector<2x1xf32> to vector<2x128xf32>
    %81 = arith.mulf %79, %80 : vector<2x128xf32>
    %82 = arith.addf %71, %81 : vector<2x128xf32>
    %83 = vector.extract_strided_slice %58 {offsets = [2, 0], sizes = [1, 128], strides = [1, 1]} : vector<5x128xf32> to vector<1x128xf32>
    %84 = vector.extract_strided_slice %7 {offsets = [0, 2], sizes = [2, 1], strides = [1, 1]} : vector<2x5xf32> to vector<2x1xf32>
    %85 = vector.broadcast %83 : vector<1x128xf32> to vector<2x128xf32>
    %86 = vector.broadcast %84 : vector<2x1xf32> to vector<2x128xf32>
    %87 = arith.mulf %85, %86 : vector<2x128xf32>
    %88 = arith.addf %77, %87 : vector<2x128xf32>
    %89 = vector.extract_strided_slice %6 {offsets = [0, 2], sizes = [2, 1], strides = [1, 1]} : vector<2x5xf32> to vector<2x1xf32>
    %90 = vector.broadcast %83 : vector<1x128xf32> to vector<2x128xf32>
    %91 = vector.broadcast %89 : vector<2x1xf32> to vector<2x128xf32>
    %92 = arith.mulf %90, %91 : vector<2x128xf32>
    %93 = arith.addf %82, %92 : vector<2x128xf32>
    %94 = vector.extract_strided_slice %58 {offsets = [3, 0], sizes = [1, 128], strides = [1, 1]} : vector<5x128xf32> to vector<1x128xf32>
    %95 = vector.extract_strided_slice %7 {offsets = [0, 3], sizes = [2, 1], strides = [1, 1]} : vector<2x5xf32> to vector<2x1xf32>
    %96 = vector.broadcast %94 : vector<1x128xf32> to vector<2x128xf32>
    %97 = vector.broadcast %95 : vector<2x1xf32> to vector<2x128xf32>
    %98 = arith.mulf %96, %97 : vector<2x128xf32>
    %99 = arith.addf %88, %98 : vector<2x128xf32>
    %100 = vector.extract_strided_slice %6 {offsets = [0, 3], sizes = [2, 1], strides = [1, 1]} : vector<2x5xf32> to vector<2x1xf32>
    %101 = vector.broadcast %94 : vector<1x128xf32> to vector<2x128xf32>
    %102 = vector.broadcast %100 : vector<2x1xf32> to vector<2x128xf32>
    %103 = arith.mulf %101, %102 : vector<2x128xf32>
    %104 = arith.addf %93, %103 : vector<2x128xf32>
    %105 = vector.extract_strided_slice %58 {offsets = [4, 0], sizes = [1, 128], strides = [1, 1]} : vector<5x128xf32> to vector<1x128xf32>
    %106 = vector.extract_strided_slice %7 {offsets = [0, 4], sizes = [2, 1], strides = [1, 1]} : vector<2x5xf32> to vector<2x1xf32>
    %107 = vector.broadcast %105 : vector<1x128xf32> to vector<2x128xf32>
    %108 = vector.broadcast %106 : vector<2x1xf32> to vector<2x128xf32>
    %109 = arith.mulf %107, %108 : vector<2x128xf32>
    %110 = arith.addf %99, %109 : vector<2x128xf32>
    %111 = vector.extract_strided_slice %6 {offsets = [0, 4], sizes = [2, 1], strides = [1, 1]} : vector<2x5xf32> to vector<2x1xf32>
    %112 = vector.broadcast %105 : vector<1x128xf32> to vector<2x128xf32>
    %113 = vector.broadcast %111 : vector<2x1xf32> to vector<2x128xf32>
    %114 = arith.mulf %112, %113 : vector<2x128xf32>
    %115 = arith.addf %104, %114 : vector<2x128xf32>
    %116 = arith.mulf %115, %2 : vector<2x128xf32>
    %117 = arith.addf %110, %116 : vector<2x128xf32>
    %118 = vector.broadcast %0 : f32 to vector<2x128xf32>
    %119 = arith.mulf %118, %115 : vector<2x128xf32>
    %120 = math.sqrt %119 : vector<2x128xf32>
    %121 = arith.mulf %120, %10 : vector<2x128xf32>
    %122 = arith.addf %117, %121 : vector<2x128xf32>
    %c0_24 = arith.constant 0 : index
    %c0_25 = arith.constant 0 : index
    %123 = vector.load %arg10[%c0_24, %c0_25] : memref<2x128xf32, #tpu.memory_space<vmem>>, vector<2x128xf32>
    tpu.vector_store %arg10[%c0_24, %c0_25], %122 {strides = array<i32>} : memref<2x128xf32, #tpu.memory_space<vmem>>, vector<2x128xf32>,
    return
  }
  func.func @transform_0(%arg0: i32) -> i32 {
    %c0_i32 = arith.constant 0 : i32
    %c0_i32_0 = arith.constant 0 : i32
    return %c0_i32 : i32
  }
  func.func @transform_1(%arg0: i32) -> (i32, i32) {
    %c0_i32 = arith.constant 0 : i32
    %c0_i32_0 = arith.constant 0 : i32
    return %c0_i32, %arg0 : i32, i32
  }
  func.func @transform_2(%arg0: i32) -> (i32, i32) {
    %c0_i32 = arith.constant 0 : i32
    %c0_i32_0 = arith.constant 0 : i32
    %c0_i32_1 = arith.constant 0 : i32
    return %c0_i32, %c0_i32_0 : i32, i32
  }
  func.func @transform_3(%arg0: i32) -> (i32, i32) {
    %c0_i32 = arith.constant 0 : i32
    %c0_i32_0 = arith.constant 0 : i32
    %c0_i32_1 = arith.constant 0 : i32
    return %c0_i32, %c0_i32_0 : i32, i32
  }
  func.func @transform_4(%arg0: i32) -> (i32, i32) {
    %c0_i32 = arith.constant 0 : i32
    %c0_i32_0 = arith.constant 0 : i32
    %c0_i32_1 = arith.constant 0 : i32
    return %c0_i32, %c0_i32_0 : i32, i32
  }
  func.func @transform_5(%arg0: i32) -> (i32, i32) {
    %c0_i32 = arith.constant 0 : i32
    %c0_i32_0 = arith.constant 0 : i32
    %c0_i32_1 = arith.constant 0 : i32
    return %c0_i32, %c0_i32_0 : i32, i32
  }
  func.func @transform_6(%arg0: i32) -> (i32, i32) {
    %c0_i32 = arith.constant 0 : i32
    %c0_i32_0 = arith.constant 0 : i32
    %c0_i32_1 = arith.constant 0 : i32
    return %c0_i32, %c0_i32_0 : i32, i32
  }
  func.func @transform_7(%arg0: i32) -> (i32, i32) {
    %c0_i32 = arith.constant 0 : i32
    %c0_i32_0 = arith.constant 0 : i32
    return %c0_i32, %arg0 : i32, i32
  }
  func.func @transform_8(%arg0: i32) -> (i32, i32) {
    %c0_i32 = arith.constant 0 : i32
    %c0_i32_0 = arith.constant 0 : i32
    return %c0_i32, %arg0 : i32, i32
  }
  func.func @transform_9(%arg0: i32) -> (i32, i32) {
    %c0_i32 = arith.constant 0 : i32
    %c0_i32_0 = arith.constant 0 : i32
    return %c0_i32, %arg0 : i32, i32
  }
}

</mosaic_0001>

<bundles_post_ra>
// kernel: tpu_custom_call.1
= control target key start
LH: loop header
LB: loop body
LE: loop exit
PB: predicated region body
PF: predicated region fallthrough
CT: control target
= control target key end

     0   :  { %v277_v1 = vmov 1   ;;  %v278_v2 = vmov 0   ;;  %s379_s0 = inlined_call_operand.<no memory space> [shape: f32[1], index: 0, kind: input, shape index: {}]   ;;  %s380_s1 = inlined_call_operand.vmem [shape: f32[2,128], index: 1, kind: input, shape index: {}]   ;;  %s381_s2 = inlined_call_operand.vmem [shape: f32[5,2], index: 2, kind: input, shape index: {}]   ;;  %s382_s3 = inlined_call_operand.vmem [shape: f32[5,2], index: 3, kind: input, shape index: {}]   ;;  %s383_s4 = inlined_call_operand.vmem [shape: f32[2,5], index: 4, kind: input, shape index: {}]   ;;  %s384_s5 = inlined_call_operand.vmem [shape: f32[2,5], index: 5, kind: input, shape index: {}]   ;;  %s385_s6 = inlined_call_operand.vmem [shape: f32[5,1], index: 6, kind: input, shape index: {}]   ;;  %s386_s7 = inlined_call_operand.vmem [shape: f32[5,128], index: 7, kind: input, shape index: {}]   ;;  %s387_s8 = inlined_call_operand.vmem [shape: f32[2,128], index: 8, kind: input, shape index: {}]   ;;  %s388_s9 = inlined_call_operand.hbm [shape: f32[2,128], index: 9, kind: output, shape index: {}]  }
   0x1   :  { %v54_v0 = vld [vmem:[%s381_s2] sm:$0x1f]  ;;  %237 = vset.pattern.permute.xlu1 %v277_v1  ;;  %236 = vset.pattern.permute.xlu0 %v278_v2 }
   0x2   :  { %v58_v3 = vld [vmem:[%s385_s6] sm:$0x1f]  ;;  %79 = vperm.xlu1 %237, %v54_v0   ;;  %63 = vperm.xlu0 %236, %v54_v0  }
   0x3   :  { %15 = vsyncpa [#allocation4], 0  ;;  %v55_v4 = vld [vmem:[%s382_s3] sm:$0x1f]  ;;  %238 = vset.pattern.permute.xlu2 %v278_v2  ;;  %v346_v6 = vstv %s379_s0  ;;  %v279_v13 = vmov 2   ;;  %v280_v15 = vmov 3   ;;  %v109_v47 = vlaneseq }
   0x4   :  { %96 = vperm.xlu2 %238, %v58_v3   ;;  %v69_v5 = vmul.f32 2.0, %v55_v4  ;;  %247 = vrcp.f32 %v346_v6  ;;  %v56_v7 = vld [vmem:[%s383_s4] sm:$0x3]  ;;  %v47_v10 = vand.u32 2147483648, %v346_v6  ;;  %vm41_vm0 = vweird.f32 %v346_v6  ;;  %s283_s21 = smov [#allocation3]   ;;  %s217_s25 = sshll.u32 %s388_s9, 4  ;;  %s218_s25 = int_to_ptr.hbm [resolvable:$true] %s217_s25 }
   0x5   :  { %v45_v12 = vand.u32 2147483647, %v346_v6  ;;  %v57_v19 = vld [vmem:[%s384_s5] sm:$0x3]  ;;  %v281_v21 = vmov 4   ;;  %vm101_vm4 = vcmask 1044480  }
   0x6   :  { %v48_v16 = vor.u32 1.1754944e-38, %v47_v10  ;;  %v362_v22 = vld [vmem:[%s380_s1] sm:$0x3]  ;;  %v110_v50 = vshrl.u32 %v109_v47, 7  ;;  %s215_s22 = sshll.u32 %s283_s21, 4  ;;  %s216_s22 = int_to_ptr.vmem [resolvable:$true] %s215_s22 }
   0x7   :  { %vm46_vm3 = vcmp.eq.f32.partialorder %v45_v12, 8.507059e+37  ;;  %v53_v25 = vmul.f32 %v362_v22, %v362_v22  ;;  %v75_v27 = vperm.slane %v362_v22, 0  ;;  %v89_v31 = vperm.slane %v362_v22, 1  ;;  %v59_v42 = vld [vmem:[%s386_s7] sm:$0x1f] }
   0x8   :  { %v111_v53 = vcvt.s32.f32 %v110_v50 }
   0x9   :  { %v66_v26 = vperm.slane %v53_v25, 0  ;;  %v82_v28 = vperm.slane %v53_v25, 1 }
   0xa   :  { %86 = vperm.xlu1 %237, %v69_v5   ;;  %72 = vperm.xlu0 %236, %v69_v5   ;;  %v248_v8 = vpop.eup %247 }
   0xb   :  { %v37_v9 = vmul.f32 %v248_v8, %v346_v6  ;;  %vm42_vm1 = vweird.f32 %v248_v8 }
   0xc   :  { %134 = vperm.xlu2 %238, %v56_v7   ;;  %vm43_vm2 = vmor %vm41_vm0, %vm42_vm1 }
   0xd   :  { %v38_v11 = vsub.f32 1.0, %v37_v9 }
   0xf   :  { %v39_v14 = vmul.f32 %v248_v8, %v38_v11 }
  0x11   :  { %v40_v17 = vadd.f32 %v248_v8, %v39_v14 }
  0x12   :  { %240 = vset.pattern.permute.xlu1 %v279_v13  ;;  %239 = vset.pattern.permute.xlu0 %v277_v1  ;;  %v282_v1 = vmov 0.0  }
  0x13   :  { %160 = vperm.xlu1 %240, %v56_v7   ;;  %147 = vperm.xlu0 %239, %v56_v7   ;;  %v44_v18 = vsel %vm43_vm2, %v248_v8, %v40_v17 }
  0x14   :  { %241 = vset.pattern.permute.xlu2 %v280_v15  ;;  %v49_v20 = vsel %vm46_vm3, %v48_v16, %v44_v18 }
  0x15   :  { %173 = vperm.xlu2 %241, %v56_v7   ;;  %227 = vpush %v49_v20 }
  0x1b   :  { %242 = vset.pattern.permute.xlu1 %v281_v21  ;;  %141 = vperm.xlu0 %239, %v57_v19  }
  0x1c   :  { %186 = vperm.xlu1 %242, %v56_v7  }
  0x1d   :  { %243 = vset.pattern.permute.xlu2 %v278_v2 }
  0x1e   :  { %127 = vperm.xlu2 %243, %v57_v19  }
  0x23   :  { %246 = vset.pattern.permute.xlu0 %v281_v21 }
  0x24   :  { %244 = vset.pattern.permute.xlu1 %v279_v13  ;;  %180 = vperm.xlu0 %246, %v57_v19  }
  0x25   :  { %154 = vperm.xlu1 %244, %v57_v19  }
  0x26   :  { %245 = vset.pattern.permute.xlu2 %v280_v15 }
  0x27   :  { %167 = vperm.xlu2 %245, %v57_v19  }
  0x46   :  { %s228_s5 = spop %227 }
  0x47   :  { %s51_s18 = smul.f32 0.5, %s228_s5 }
  0x49   :  { %v92_v38 = vstv %s51_s18 }
  0x5e   :  { %v97_v41 = vpop.permute.xlu2 %96 }
  0x66   :  { %v135_v62 = vpop.permute.xlu2 %134 }
  0x6f   :  { %v174_v11 = vpop.permute.xlu2 %173 }
  0x74   :  { %v80_v23 = vpop.permute.xlu1 %79  ;;  %v64_v24 = vpop.permute.xlu0 %63 }
  0x75   :  { %v67_v30 = vmul.f32 %v66_v26, %v64_v24  ;;  %v83_v34 = vmul.f32 %v82_v28, %v80_v23 }
  0x78   :  { %v128_v23 = vpop.permute.xlu2 %127 }
  0x7c   :  { %v73_v29 = vpop.permute.xlu0 %72  ;;  %v87_v33 = vpop.permute.xlu1 %86 }
  0x7d   :  { %v76_v32 = vmul.f32 %v75_v27, %v73_v29  ;;  %v90_v36 = vmul.f32 %v89_v31, %v87_v33 }
  0x7f   :  { %v77_v35 = vadd.f32 %v76_v32, %v67_v30 }
  0x81   :  { %v84_v37 = vadd.f32 %v83_v34, %v77_v35  ;;  %v168_v33 = vpop.permute.xlu2 %167 }
  0x83   :  { %v91_v39 = vadd.f32 %v90_v36, %v84_v37 }
  0x85   :  { %v93_v40 = vmul.f32 %v92_v38, %v91_v39  ;;  %v161_v0 = vpop.permute.xlu1 %160  ;;  %v148_v7 = vpop.permute.xlu0 %147 }
  0x87   :  { %v99_v43 = vadd.f32 %v97_v41, %v93_v40 }
  0x89   :  { %v100_v44 = vadd.f32 %v99_v43, %v59_v42  ;;  %v60_v43 = vld [vmem:[%s387_s8] sm:$0x3] }
  0x8b   :  { %v102_v45 = vsel %vm101_vm4, %v100_v44, -inf }
  0x8c   :  { %v103_v46 = vrot.slane %v102_v45, 4 }
  0x8d   :  { %v142_v24 = vpop.permute.xlu0 %141 }
  0x8e   :  { %v104_v48 = vmax.f32 %v102_v45, %v103_v46  ;;  %v187_v17 = vpop.permute.xlu1 %186 }
  0x90   :  { %v105_v49 = vrot.slane %v104_v48, 2 }
  0x92   :  { %v106_v51 = vmax.f32 %v104_v48, %v105_v49 }
  0x94   :  { %v107_v52 = vrot.slane %v106_v51, 1 }
  0x96   :  { %v108_v54 = vmax.f32 %v106_v51, %v107_v52  ;;  %v181_v38 = vpop.permute.xlu0 %180 }
  0x97   :  { %v155_v28 = vpop.permute.xlu1 %154 }
  0x98   :  { %vm112_vm5 = vcmp.ge.f32.partialorder %v100_v44, %v108_v54 }
  0x99   :  { %v113_v55 = vsel %vm112_vm5, %v111_v53, 5.0 }
  0x9a   :  { %v114_v56 = vsel %vm101_vm4, %v113_v55, inf }
  0x9b   :  { %v115_v57 = vrot.slane %v114_v56, 4 }
  0x9d   :  { %v116_v58 = vmin.f32 %v114_v56, %v115_v57 }
  0x9f   :  { %v117_v59 = vrot.slane %v116_v58, 2 }
  0xa1   :  { %v118_v60 = vmin.f32 %v116_v58, %v117_v59 }
  0xa3   :  { %v119_v61 = vrot.slane %v118_v60, 1 }
  0xa5   :  { %v120_v63 = vmin.f32 %v118_v60, %v119_v61 }
  0xa7   :  { %vm121_vm6 = vcmp.eq.f32.partialorder %v111_v53, %v120_v63 }
  0xa8   :  { %v226_v2 = vsel %vm121_vm6, 1.0, %v282_v1 }
  0xa9   :  { %v124_v3 = vperm.slane %v226_v2, 0  ;;  %v152_v4 = vperm.slane %v226_v2, 2  ;;  %v139_v5 = vperm.slane %v226_v2, 1  ;;  %v165_v9 = vperm.slane %v226_v2, 3 }
  0xaa   :  { %v178_v14 = vperm.slane %v226_v2, 4 }
  0xab   :  { %v137_v8 = vmul.f32 %v135_v62, %v124_v3  ;;  %v150_v10 = vmul.f32 %v148_v7, %v139_v5  ;;  %v163_v12 = vmul.f32 %v161_v0, %v152_v4  ;;  %v176_v15 = vmul.f32 %v174_v11, %v165_v9 }
  0xac   :  { %v189_v19 = vmul.f32 %v187_v17, %v178_v14  ;;  %v130_v25 = vmul.f32 %v128_v23, %v124_v3  ;;  %v144_v26 = vmul.f32 %v142_v24, %v139_v5  ;;  %v157_v31 = vmul.f32 %v155_v28, %v152_v4 }
  0xad   :  { %v151_v13 = vadd.f32 %v150_v10, %v137_v8  ;;  %v170_v36 = vmul.f32 %v168_v33, %v165_v9  ;;  %v183_v41 = vmul.f32 %v181_v38, %v178_v14 }
  0xae   :  { %v145_v29 = vadd.f32 %v144_v26, %v130_v25 }
  0xaf   :  { %v164_v16 = vadd.f32 %v163_v12, %v151_v13 }
  0xb0   :  { %v158_v34 = vadd.f32 %v157_v31, %v145_v29 }
  0xb1   :  { %v177_v18 = vadd.f32 %v176_v15, %v164_v16 }
  0xb2   :  { %v171_v39 = vadd.f32 %v170_v36, %v158_v34 }
  0xb3   :  { %v190_v20 = vadd.f32 %v189_v19, %v177_v18 }
  0xb4   :  { %v184_v45 = vadd.f32 %v183_v41, %v171_v39 }
  0xb5   :  { %v194_v21 = vmul.f32 %v190_v20, %v346_v6  ;;  %v191_v6 = vmul.f32 %v190_v20, %v362_v22 }
  0xb7   :  { %249 = vrsqrt.f32 %v194_v21  ;;  %vm202_vm7 = vcmp.eq.f32.partialorder %v194_v21, inf  ;;  %v205_v44 = vand.u32 2147483648, %v194_v21  ;;  %vm204_vm8 = vcmp.eq.f32.partialorder %v194_v21, 0.0 }
  0xb8   :  { %v192_v48 = vadd.f32 %v191_v6, %v184_v45 }
  0xbd   :  { %v250_v27 = vpop.eup %249 }
  0xbe   :  { %v196_v30 = vmul.f32 %v250_v27, %v194_v21 }
  0xc0   :  { %v197_v32 = vmul.f32 %v250_v27, %v196_v30 }
  0xc2   :  { %v198_v35 = vmul.f32 0.5, %v197_v32 }
  0xc4   :  { %v199_v37 = vsub.f32 1.5, %v198_v35 }
  0xc6   :  { %v200_v40 = vmul.f32 %v250_v27, %v199_v37 }
  0xc8   :  { %v201_v42 = vmul.f32 %v200_v40, %v194_v21 }
  0xca   :  { %v203_v46 = vsel %vm202_vm7, %v194_v21, %v201_v42 }
  0xcb   :  { %v206_v47 = vsel %vm204_vm8, %v205_v44, %v203_v46 }
  0xcc   :  { %v207_v22 = vmul.f32 %v206_v47, %v60_v43 }
  0xce   :  { %v208_v49 = vadd.f32 %v207_v22, %v192_v48 }
  0xd0   :  { %209 = vst [vmem:[#allocation3] sm:$0x3] %v208_v49 }
  0xd1   :  { %220 = dma.vmem_to_hbm [thread:$0]  %s216_s22, 32, %s218_s25, [#allocation4]  }
  0xd2   :  { %275 = dma.done.wait [#allocation4], 32  }
  0xd3   :  { %276 = vsyncadd [#allocation4], 4294967264 }
  0xd4   :  { %225 = vsyncpa [#allocation4], 1 }

</bundles_post_ra>
